<compile_context>
chip_gen: v5e
topology: v5e:2x2
jax: 0.10.0
libtpu: 0.0.40
codegen_flags: <defaults>
</compile_context>

<pallas_src>
import math

import numpy as np
import jax
import jax.numpy as jnp
from jax.experimental import pallas as pl
from jax.experimental.pallas import tpu as pltpu

D_MODEL = 1
NUM_HEADS = 1
D_FF = 1024
NUM_LAYERS = 6
D_OUTPUT = 15
LN_EPS = 1e-5


# ----------------------------- Pallas kernel ---------------------------------

def fc_broadcast_kernel(beta_ref, fc_tab_ref, out_ref):
    """Final fc layer applied to the (provably constant) decoder output.

    beta_ref:   SMEM (1,) f32      -- norm3.beta of the last decoder layer
                                      (== the decoder output at every position).
    fc_tab_ref: VMEM (2, D_OUTPUT) -- row 0 = fc.weight as a lane-dense row,
                                      row 1 = fc.bias.
    out_ref:    VMEM (B, S, D_OUTPUT)
    """
    B, S, _ = out_ref.shape
    beta3 = beta_ref[0]                              # scalar read from SMEM
    w_row = fc_tab_ref[0:1, :]                       # (1, D_OUTPUT)
    b_row = fc_tab_ref[1:2, :]                       # (1, D_OUTPUT)
    xd = jnp.full((B, S), beta3, dtype=jnp.float32)  # constant decoder output
    out_ref[...] = xd[:, :, None] * w_row + b_row    # (B,S,1)*(1,D)+(1,D)


# ----------------------------- host-side fold (once, at init) ----------------

def fold_params(dec_params, fc_w, fc_b):
    """One-time fold of the input-independent network tail.

    Returns the two arrays the kernel needs:
      dec_beta3: (1,)  f32  -- last decoder layer's norm3.beta scalar
      fc_tab:    (2, D_OUTPUT) f32 -- [fc.weight row; fc.bias row]
    Run this OUTSIDE the jitted per-call path (review item: no per-call packing).
    """
    assert D_MODEL == 1 and NUM_HEADS == 1, (
        "constant-fold of LayerNorm is only valid for d_model == 1")
    be3 = dec_params[-1][-1]                         # (1, 1) norm3.beta, last layer
    dec_beta3 = jnp.reshape(be3, (1,)).astype(jnp.float32)
    fc_tab = jnp.concatenate([fc_w.T, fc_b], axis=0).astype(jnp.float32)  # (2, D)
    return dec_beta3, fc_tab


@jax.jit
def transformer_forward(src, dec_beta3, fc_tab):
    # The output is provably independent of `src` (see header derivation);
    # `src` is only consulted for its static (B, S) shape.
    B, S, _ = src.shape
    vmem = pl.BlockSpec(memory_space=pltpu.MemorySpace.VMEM)
    smem = pl.BlockSpec(memory_space=pltpu.MemorySpace.SMEM)
    return pl.pallas_call(
        fc_broadcast_kernel,
        out_shape=jax.ShapeDtypeStruct((B, S, D_OUTPUT), jnp.float32),
        in_specs=[smem, vmem],
        out_specs=vmem,
    )(dec_beta3, fc_tab)


# ----------------------------- parameter init (PyTorch layouts) --------------

def linear_params(key, fan_in, fan_out):
    k1, k2 = jax.random.split(key)
    bound = 1.0 / math.sqrt(fan_in)
    w = jax.random.uniform(k1, (fan_out, fan_in), jnp.float32, -bound, bound)
    b = jax.random.uniform(k2, (1, fan_out), jnp.float32, -bound, bound)
    return w, b


def mha_params(key, d_model):
    ps = []
    for k in jax.random.split(key, 4):       # W_q, W_k, W_v, W_o
        w, b = linear_params(k, d_model, d_model)
        ps += [w, b]
    return ps


def ln_params(key, d_model):
    # Random gamma/beta (instead of PyTorch's ones/zeros default) so the
    # correctness check below actually exercises the beta-fold; the fold is
    # exact for arbitrary parameter values (e.g. after training).
    k1, k2 = jax.random.split(key)
    gamma = jax.random.uniform(k1, (1, d_model), jnp.float32, 0.5, 1.5)
    beta = jax.random.uniform(k2, (1, d_model), jnp.float32, -0.5, 0.5)
    return [gamma, beta]


def ffn_params(key, d_model, d_ff):
    k1, k2 = jax.random.split(key)
    w1, b1 = linear_params(k1, d_model, d_ff)
    w2, b2 = linear_params(k2, d_ff, d_model)
    return [w1, b1, w2, b2]


def init_params(key, d_model, d_ff, num_layers, d_output):
    keys = jax.random.split(key, 2 * num_layers + 1)
    enc_params, dec_params = [], []
    for i in range(num_layers):
        k1, k2, k3, k4 = jax.random.split(keys[i], 4)
        enc_params.append(mha_params(k1, d_model) + ln_params(k3, d_model)
                          + ffn_params(k2, d_model, d_ff) + ln_params(k4, d_model))
    for i in range(num_layers):
        ks = jax.random.split(keys[num_layers + i], 6)
        dec_params.append(mha_params(ks[0], d_model) + ln_params(ks[3], d_model)
                          + mha_params(ks[1], d_model) + ln_params(ks[4], d_model)
                          + ffn_params(ks[2], d_model, d_ff) + ln_params(ks[5], d_model))
    fc_w, fc_b = linear_params(keys[-1], d_model, d_output)
    return enc_params, dec_params, fc_w, fc_b


# ----------------------------- pure-JAX full (un-folded) reference -----------

def _ref_ln(x, gamma, beta, eps=LN_EPS):
    mu = jnp.mean(x, axis=-1, keepdims=True)
    var = jnp.mean((x - mu) ** 2, axis=-1, keepdims=True)
    return (x - mu) * jax.lax.rsqrt(var + eps) * gamma + beta


def _ref_mha(xq, xkv, mask, wq, bq, wk, bk, wv, bv, wo, bo):
    d_k = wq.shape[0] // NUM_HEADS
    q = jnp.dot(xq, wq.T) + bq
    k = jnp.dot(xkv, wk.T) + bk
    v = jnp.dot(xkv, wv.T) + bv
    scores = jnp.dot(q, k.T) / math.sqrt(d_k)
    scores = jnp.where(mask == 0.0, -1.0e9, scores)
    scores = scores - jnp.max(scores, axis=-1, keepdims=True)
    p = jnp.exp(scores)
    probs = p / jnp.sum(p, axis=-1, keepdims=True)
    return jnp.dot(jnp.dot(probs, v), wo.T) + bo


def _ref_ffn(x, w1, b1, w2, b2):
    h = jnp.maximum(jnp.dot(x, w1.T) + b1, 0.0)
    return jnp.dot(h, w2.T) + b2


def ref_forward(src, enc_params, dec_params, fc_w, fc_b):
    B, S, D = src.shape
    mask3 = (src[:, :, 0] != 0).astype(jnp.float32).reshape(B, 1, S)

    def enc_layer(x, m, p):
        (wq, bq, wk, bk, wv, bv, wo, bo, g1, be1, w1, b1, w2, b2, g2, be2) = p
        attn = _ref_mha(x, x, m, wq, bq, wk, bk, wv, bv, wo, bo)
        h = _ref_ln(x + attn, g1, be1)
        return _ref_ln(h + _ref_ffn(h, w1, b1, w2, b2), g2, be2)

    def dec_layer(enc, m, p):
        (swq, sbq, swk, sbk, swv, sbv, swo, sbo, g1, be1,
         cwq, cbq, cwk, cbk, cwv, cbv, cwo, cbo, g2, be2,
         w1, b1, w2, b2, g3, be3) = p
        attn = _ref_mha(enc, enc, m, swq, sbq, swk, sbk, swv, sbv, swo, sbo)
        x = _ref_ln(enc + attn, g1, be1)
        attn = _ref_mha(x, enc, m, cwq, cbq, cwk, cbk, cwv, cbv, cwo, cbo)
        x = _ref_ln(x + attn, g2, be2)
        return _ref_ln(x + _ref_ffn(x, w1, b1, w2, b2), g3, be3)

    enc = src
    for p in enc_params:
        enc = jax.vmap(lambda x, m: enc_layer(x, m, p))(enc, mask3)
    dec = enc
    for p in dec_params:   # reference feeds enc_output to every decoder layer
        dec = jax.vmap(lambda x, m: dec_layer(x, m, p))(enc, mask3)
    return jax.vmap(lambda x: jnp.dot(x, fc_w.T) + fc_b)(dec)


# ----------------------------- main -------------------------------------------

if __name__ == "__main__":
    batch, seq_len = 4, 8
    key = jax.random.PRNGKey(0)
    k_inp, k_par = jax.random.split(key)

    src = jax.random.normal(k_inp, (batch, seq_len, D_MODEL), jnp.float32)
    # zero out some tokens so the (src != 0) mask path exists in the reference
    src = src.at[0, 5:, :].set(0.0)
    src = src.at[2, 0, :].set(0.0)

    enc_params, dec_params, fc_w, fc_b = init_params(
        k_par, D_MODEL, D_FF, NUM_LAYERS, D_OUTPUT)

    # One-time fold at init (outside the jitted per-call path).
    dec_beta3, fc_tab = fold_params(dec_params, fc_w, fc_b)

    out = transformer_forward(src, dec_beta3, fc_tab)
    out = jax.block_until_ready(out)
    assert out.shape == (batch, seq_len, D_OUTPUT)

    # Validate the folded kernel against the full, un-folded forward pass.
    ref = ref_forward(src, enc_params, dec_params, fc_w, fc_b)
    np.testing.assert_allclose(np.asarray(out), np.asarray(ref),
                               rtol=1e-5, atol=1e-5)

    print("KERNEL_OK")
</pallas_src>

<mosaic_0001>
module attributes {stable_mosaic.version = 11 : i64} {
  func.func @fc_broadcast_kernel(%arg0: memref<1xf32, #tpu.memory_space<smem>>, %arg1: memref<2x15xf32, #tpu.memory_space<vmem>>, %arg2: memref<4x8x15xf32, #tpu.memory_space<vmem>>) attributes {dimension_semantics = [], scalar_prefetch = 0 : i64, scratch_operands = 0 : i64, tpu.core_type = #tpu.core_type<tc>} {
    %c0 = arith.constant 0 : index
    %0 = memref.load %arg0[%c0] : memref<1xf32, #tpu.memory_space<smem>>
    %c0_0 = arith.constant 0 : index
    %c0_1 = arith.constant 0 : index
    %1 = vector.load %arg1[%c0_0, %c0_1] : memref<2x15xf32, #tpu.memory_space<vmem>>, vector<1x15xf32>
    %c1 = arith.constant 1 : index
    %c0_2 = arith.constant 0 : index
    %2 = vector.load %arg1[%c1, %c0_2] : memref<2x15xf32, #tpu.memory_space<vmem>>, vector<1x15xf32>
    %3 = vector.broadcast %0 : f32 to vector<4x8xf32>
    %4 = vector.shape_cast %3 : vector<4x8xf32> to vector<4x8x1xf32>
    %5 = vector.shape_cast %1 : vector<1x15xf32> to vector<1x1x15xf32>
    %6 = vector.broadcast %4 : vector<4x8x1xf32> to vector<4x8x15xf32>
    %7 = vector.broadcast %5 : vector<1x1x15xf32> to vector<4x8x15xf32>
    %8 = arith.mulf %6, %7 : vector<4x8x15xf32>
    %9 = vector.shape_cast %2 : vector<1x15xf32> to vector<1x1x15xf32>
    %10 = vector.broadcast %9 : vector<1x1x15xf32> to vector<4x8x15xf32>
    %11 = arith.addf %8, %10 : vector<4x8x15xf32>
    %c0_3 = arith.constant 0 : index
    %c0_4 = arith.constant 0 : index
    %c0_5 = arith.constant 0 : index
    %12 = vector.load %arg2[%c0_3, %c0_4, %c0_5] : memref<4x8x15xf32, #tpu.memory_space<vmem>>, vector<4x8x15xf32>
    tpu.vector_store %arg2[%c0_3, %c0_4, %c0_5], %11 {strides = array<i32>} : memref<4x8x15xf32, #tpu.memory_space<vmem>>, vector<4x8x15xf32>,
    return
  }
}

</mosaic_0001>

<bundles_post_ra>
// kernel: transformer_forward.1
= control target key start
LH: loop header
LB: loop body
LE: loop exit
PB: predicated region body
PF: predicated region fallthrough
CT: control target
= control target key end

     0   :  { %s105_s0 = inlined_call_operand.<no memory space> [shape: f32[1], index: 0, kind: input, shape index: {}]   ;;  %s106_s1 = inlined_call_operand.vmem [shape: f32[2,15], index: 1, kind: input, shape index: {}]   ;;  %s107_s2 = inlined_call_operand.hbm [shape: f32[4,8,15], index: 2, kind: output, shape index: {}]  }
   0x1   :  { %v16_v0 = vstv %s105_s0  ;;  %v47_v1 = vld [vmem:[%s106_s1] ss:$0 sm:$0xff]  ;;  %v48_v2 = vld [vmem:[%s106_s1 + $0x1] ss:$0 sm:$0xff] }
   0x2   :  { %8 = vsyncpa [#allocation4], 0  ;;  %v18_v3 = vmul.f32 %v47_v1, %v16_v0  ;;  %vm21_vm0 = vcmask 121856   ;;  %s75_s15 = smov [#allocation3]   ;;  %s32_s19 = sshll.u32 %s107_s2, 4  ;;  %s33_s19 = int_to_ptr.hbm [resolvable:$true] %s32_s19 }
   0x3   :  { %s30_s16 = sshll.u32 %s75_s15, 4  ;;  %s76_s0 = smov 128   ;;  %s31_s16 = int_to_ptr.vmem [resolvable:$true] %s30_s16 }
   0x4   :  { %v20_v4 = vadd.f32 %v48_v2, %v18_v3  ;;  %s77_s20 = smov 8  }
   0x6   :  { %22 = vst.msk [vmem:[#allocation3] sm:$0xff] %vm21_vm0, %v20_v4 }
   0x7   :  { %23 = vst.msk [vmem:[#allocation3 + $0x8] sm:$0xff] %vm21_vm0, %v20_v4 }
   0x8   :  { %24 = vst.msk [vmem:[#allocation3 + $0x10] sm:$0xff] %vm21_vm0, %v20_v4 }
   0x9   :  { %25 = vst.msk [vmem:[#allocation3 + $0x18] sm:$0xff] %vm21_vm0, %v20_v4 }
   0xa   :  { %38 = dma.vmem_to_hbm [thread:$0]  %s31_s16, 512, %s33_s19, [#allocation4], %s76_s0, %s76_s0, %s77_s20  }
   0xb   :  { %73 = dma.done.wait [#allocation4], 512  }
   0xc   :  { %74 = vsyncadd [#allocation4], 4294966784 }
   0xd   :  { %43 = vsyncpa [#allocation4], 1 }

</bundles_post_ra>
